<compile_context>
chip_gen: v7x
topology: tpu7x:2x2x1
jax: 0.10.0
libtpu: 0.0.40
codegen_flags: <defaults>
</compile_context>

<pallas_src>
import math
import jax
import jax.numpy as jnp
from jax import lax
from jax.experimental import pallas as pl
from jax.experimental.pallas import tpu as pltpu

_MIB = 1024 * 1024


# --------------------------------------------------------------------------
# Kernel 1: fused QKV projection.  One grid step = one (Tm, E) slab of x.
# --------------------------------------------------------------------------
def _qkv_proj_kernel(x_ref, wq_ref, wk_ref, wv_ref, bq_ref, bk_ref, bv_ref,
                     q_ref, k_ref, v_ref):
    x = x_ref[...]
    # Three N=E MXU passes, f32 accumulate, written directly in compute dtype
    # (no wide f32 intermediate, no lane slices).
    q_ref[...] = (jnp.dot(x, wq_ref[...], preferred_element_type=jnp.float32)
                  + bq_ref[...]).astype(q_ref.dtype)
    k_ref[...] = (jnp.dot(x, wk_ref[...], preferred_element_type=jnp.float32)
                  + bk_ref[...]).astype(k_ref.dtype)
    v_ref[...] = (jnp.dot(x, wv_ref[...], preferred_element_type=jnp.float32)
                  + bv_ref[...]).astype(v_ref.dtype)


# --------------------------------------------------------------------------
# Kernel 2: flash-style attention.  Grid = (B, S//Tq, S//Tk); the key axis is
# the (last, "arbitrary") reduction axis with online-softmax accumulators.
# --------------------------------------------------------------------------
def _flash_attn_kernel(q_ref, k_ref, v_ref, o_ref, m_sc, l_sc, acc_sc):
    ki = pl.program_id(2)

    @pl.when(ki == 0)
    def _init():
        m_sc[...] = jnp.full_like(m_sc, -jnp.inf)
        l_sc[...] = jnp.zeros_like(l_sc)
        acc_sc[...] = jnp.zeros_like(acc_sc)

    q = q_ref[...]                                     # (Tq, E)  scale pre-folded
    k = k_ref[...]                                     # (Tk, E)

    # scores = q @ k^T without materializing k^T (contract last dims).
    s = lax.dot_general(q, k, (((1,), (1,)), ((), ())),
                        preferred_element_type=jnp.float32)   # (Tq, Tk) f32

    m_prev = m_sc[...]
    m_new = jnp.maximum(m_prev, jnp.max(s, axis=-1, keepdims=True))
    alpha = jnp.exp(m_prev - m_new)                    # rescale previous partials
    p = jnp.exp(s - m_new)                             # (Tq, Tk) f32

    l_sc[...] = alpha * l_sc[...] + jnp.sum(p, axis=-1, keepdims=True)
    acc_sc[...] = alpha * acc_sc[...] + jnp.dot(
        p.astype(v_ref.dtype), v_ref[...], preferred_element_type=jnp.float32)
    m_sc[...] = m_new

    # TODO(synk): nn.Dropout(0.2) on the attention probabilities is identity in
    # eval mode; training-mode stochastic dropout (pltpu.prng_*) not applied.

    @pl.when(ki == pl.num_programs(2) - 1)
    def _finalize():
        inv_l = pl.reciprocal(l_sc[...], approx=True)  # EUP slot, ~free
        o_ref[...] = (acc_sc[...] * inv_l).astype(o_ref.dtype)


# --------------------------------------------------------------------------
# Wrapper.
# --------------------------------------------------------------------------
def _vmem_limit_bytes():
    # 64 MiB is comfortable where physical VMEM is 128 MiB (v5e/v6e); on v7x
    # (64 MiB physical) leave headroom for double-buffers + compiler scratch.
    try:
        cap = pltpu.get_tpu_info().vmem_capacity_bytes
    except Exception:
        cap = 128 * _MIB
    return 64 * _MIB if cap >= 128 * _MIB else 48 * _MIB


def _pick_tile(S, candidates):
    for c in candidates:
        if S % c == 0:
            return c
    return S  # small / odd S: one full-length tile


def self_attention(x, wq, wk, wv, bq, bk, bv, *, tq=None, tk=None,
                   compute_dtype=None):
    """Forward pass of the CLIP SelfAttention module (eval mode).

    x: (B, S, E); wq/wk/wv: (E, E) PyTorch-layout (out, in); bq/bk/bv: (E,).
    tq defaults to 256-preferred (v6e/v7x); pass tq=128 on v5e.
    compute_dtype=jnp.bfloat16 enables bf16 MXU operands (f32 accumulation).
    """
    B, S, E = x.shape
    out_dtype = x.dtype
    cdt = compute_dtype if compute_dtype is not None else x.dtype
    scale = 1.0 / math.sqrt(E)                         # uses the ORIGINAL E

    # --- lane-density: pad E up to a multiple of 128 (zero pad is exact: the
    # padded Q/K columns contribute 0 to scores, padded V columns produce 0
    # outputs which are sliced off below). ---
    Ep = ((E + 127) // 128) * 128
    pe = Ep - E
    if pe:
        x = jnp.pad(x, ((0, 0), (0, 0), (0, pe)))
        wq = jnp.pad(wq, ((0, pe), (0, pe)))
        wk = jnp.pad(wk, ((0, pe), (0, pe)))
        wv = jnp.pad(wv, ((0, pe), (0, pe)))
        bq = jnp.pad(bq, (0, pe))
        bk = jnp.pad(bk, (0, pe))
        bv = jnp.pad(bv, (0, pe))

    # Trace-time weight prep (fused by XLA): (out,in)->(in,out) transpose,
    # fold 1/sqrt(E) into the Q projection.
    x_c = x.astype(cdt)
    wq_t = (wq.T * scale).astype(cdt)                  # (Ep, Ep)
    wk_t = wk.T.astype(cdt)
    wv_t = wv.T.astype(cdt)
    bq2 = (bq * scale).reshape(1, Ep).astype(jnp.float32)
    bk2 = bk.reshape(1, Ep).astype(jnp.float32)
    bv2 = bv.reshape(1, Ep).astype(jnp.float32)

    vmem_limit = _vmem_limit_bytes()

    # ---------------- 1) QKV projection (runs once over the sequence) -------
    tm = _pick_tile(S, (256, 128))
    proj_grid = pltpu.PrefetchScalarGridSpec(
        num_scalar_prefetch=0,
        grid=(B, S // tm),
        in_specs=[
            pl.BlockSpec((None, tm, Ep), lambda b, i: (b, i, 0)),   # x slab
            pl.BlockSpec((Ep, Ep), lambda b, i: (0, 0)),            # Wq^T * scale
            pl.BlockSpec((Ep, Ep), lambda b, i: (0, 0)),            # Wk^T
            pl.BlockSpec((Ep, Ep), lambda b, i: (0, 0)),            # Wv^T
            pl.BlockSpec((1, Ep), lambda b, i: (0, 0)),             # bq * scale
            pl.BlockSpec((1, Ep), lambda b, i: (0, 0)),             # bk
            pl.BlockSpec((1, Ep), lambda b, i: (0, 0)),             # bv
        ],
        out_specs=[pl.BlockSpec((None, tm, Ep), lambda b, i: (b, i, 0))] * 3,
    )
    q, k, v = pl.pallas_call(
        _qkv_proj_kernel,
        out_shape=(jax.ShapeDtypeStruct((B, S, Ep), cdt),) * 3,
        grid_spec=proj_grid,
        compiler_params=pltpu.CompilerParams(
            dimension_semantics=("parallel", "parallel"),
            vmem_limit_bytes=vmem_limit),
    )(x_c, wq_t, wk_t, wv_t, bq2, bk2, bv2)

    # ---------------- 2) flash attention over key tiles ---------------------
    if tq is None:
        tq = _pick_tile(S, (256, 128))    # 256 fills the v6e/v7x MXU; use 128 on v5e
    if tk is None:
        tk = _pick_tile(S, (512, 256, 128))
    assert S % tq == 0 and S % tk == 0

    attn_grid = pltpu.PrefetchScalarGridSpec(
        num_scalar_prefetch=0,
        grid=(B, S // tq, S // tk),
        in_specs=[
            pl.BlockSpec((None, tq, Ep), lambda b, qi, ki: (b, qi, 0)),  # Q tile
            pl.BlockSpec((None, tk, Ep), lambda b, qi, ki: (b, ki, 0)),  # K tile
            pl.BlockSpec((None, tk, Ep), lambda b, qi, ki: (b, ki, 0)),  # V tile
        ],
        out_specs=pl.BlockSpec((None, tq, Ep), lambda b, qi, ki: (b, qi, 0)),
        scratch_shapes=[
            pltpu.VMEM((tq, 1), jnp.float32),    # running max m
            pltpu.VMEM((tq, 1), jnp.float32),    # running denom l
            pltpu.VMEM((tq, Ep), jnp.float32),   # running context acc
        ],
    )
    out = pl.pallas_call(
        _flash_attn_kernel,
        out_shape=jax.ShapeDtypeStruct((B, S, Ep), out_dtype),
        grid_spec=attn_grid,
        compiler_params=pltpu.CompilerParams(
            dimension_semantics=("parallel", "parallel", "arbitrary"),
            vmem_limit_bytes=vmem_limit),
    )(q, k, v)

    if pe:
        out = out[..., :E]
    return out


# --------------------------------------------------------------------------
# Pure-JAX reference (PyTorch module semantics, eval mode).
# --------------------------------------------------------------------------
def reference(x, wq, wk, wv, bq, bk, bv):
    E = x.shape[-1]
    q = x @ wq.T + bq
    k = x @ wk.T + bk
    v = x @ wv.T + bv
    scores = jnp.einsum("bse,bte->bst", q, k) / math.sqrt(E)
    probs = jax.nn.softmax(scores, axis=-1)
    return jnp.einsum("bst,bte->bse", probs, v)


if __name__ == "__main__":
    B, S, E = 2, 8, 32  # batch, seq, embed_dim

    key = jax.random.PRNGKey(0)
    kx, kwq, kwk, kwv, kbq, kbk, kbv = jax.random.split(key, 7)

    x = jax.random.normal(kx, (B, S, E), dtype=jnp.float32)

    # Deterministic parameter init (uniform like nn.Linear's default range).
    bound = 1.0 / math.sqrt(E)
    wq = jax.random.uniform(kwq, (E, E), jnp.float32, -bound, bound)
    wk = jax.random.uniform(kwk, (E, E), jnp.float32, -bound, bound)
    wv = jax.random.uniform(kwv, (E, E), jnp.float32, -bound, bound)
    bq = jax.random.uniform(kbq, (E,), jnp.float32, -bound, bound)
    bk = jax.random.uniform(kbk, (E,), jnp.float32, -bound, bound)
    bv = jax.random.uniform(kbv, (E,), jnp.float32, -bound, bound)

    out = self_attention(x, wq, wk, wv, bq, bk, bv)
    out = jax.block_until_ready(out)

    ref = reference(x, wq, wk, wv, bq, bk, bv)
    assert out.shape == (B, S, E)
    # Tolerance loosened slightly vs pure-f32 because the softmax denominator
    # uses the EUP approximate reciprocal.
    assert jnp.allclose(out, ref, atol=2e-3, rtol=2e-3), "mismatch vs reference"

    print("KERNEL_OK")
</pallas_src>

<mosaic_0001>
module attributes {stable_mosaic.version = 11 : i64} {
  func.func @_qkv_proj_kernel(%arg0: i32, %arg1: i32, %arg2: memref<1x8x128xf32, #tpu.memory_space<vmem>>, %arg3: memref<128x128xf32, #tpu.memory_space<vmem>>, %arg4: memref<128x128xf32, #tpu.memory_space<vmem>>, %arg5: memref<128x128xf32, #tpu.memory_space<vmem>>, %arg6: memref<1x128xf32, #tpu.memory_space<vmem>>, %arg7: memref<1x128xf32, #tpu.memory_space<vmem>>, %arg8: memref<1x128xf32, #tpu.memory_space<vmem>>, %arg9: memref<1x8x128xf32, #tpu.memory_space<vmem>>, %arg10: memref<1x8x128xf32, #tpu.memory_space<vmem>>, %arg11: memref<1x8x128xf32, #tpu.memory_space<vmem>>) attributes {dimension_semantics = [#tpu.dimension_semantics<parallel>, #tpu.dimension_semantics<parallel>], iteration_bounds = array<i64: 2, 1>, scalar_prefetch = 0 : i64, scratch_operands = 0 : i64, tpu.core_type = #tpu.core_type<tc>, window_params = [{transform_indices = @transform_0, window_bounds = array<i64: 1, 8, 128>}, {pipeline_mode = #tpu.pipeline_mode<synchronous>, transform_indices = @transform_1, window_bounds = array<i64: 128, 128>}, {pipeline_mode = #tpu.pipeline_mode<synchronous>, transform_indices = @transform_2, window_bounds = array<i64: 128, 128>}, {pipeline_mode = #tpu.pipeline_mode<synchronous>, transform_indices = @transform_3, window_bounds = array<i64: 128, 128>}, {pipeline_mode = #tpu.pipeline_mode<synchronous>, transform_indices = @transform_4, window_bounds = array<i64: 1, 128>}, {pipeline_mode = #tpu.pipeline_mode<synchronous>, transform_indices = @transform_5, window_bounds = array<i64: 1, 128>}, {pipeline_mode = #tpu.pipeline_mode<synchronous>, transform_indices = @transform_6, window_bounds = array<i64: 1, 128>}, {transform_indices = @transform_7, window_bounds = array<i64: 1, 8, 128>}, {transform_indices = @transform_8, window_bounds = array<i64: 1, 8, 128>}, {transform_indices = @transform_9, window_bounds = array<i64: 1, 8, 128>}]} {
    %c0 = arith.constant 0 : index
    %c0_0 = arith.constant 0 : index
    %c0_1 = arith.constant 0 : index
    %0 = vector.load %arg2[%c0, %c0_0, %c0_1] : memref<1x8x128xf32, #tpu.memory_space<vmem>>, vector<1x8x128xf32>
    %1 = vector.shape_cast %0 : vector<1x8x128xf32> to vector<8x128xf32>
    %c0_2 = arith.constant 0 : index
    %c0_3 = arith.constant 0 : index
    %2 = vector.load %arg3[%c0_2, %c0_3] : memref<128x128xf32, #tpu.memory_space<vmem>>, vector<128x128xf32>
    %cst = arith.constant dense<0.000000e+00> : vector<8x128xf32>
    %3 = tpu.matmul %1, %2, %cst {dimension_numbers = #tpu.dot_dimension_numbers<[1], [0], [0], [1], [0, 0, 1, 1], [], []>} : vector<8x128xf32>, vector<128x128xf32>, vector<8x128xf32> -> vector<8x128xf32>
    %c0_4 = arith.constant 0 : index
    %c0_5 = arith.constant 0 : index
    %4 = vector.load %arg6[%c0_4, %c0_5] : memref<1x128xf32, #tpu.memory_space<vmem>>, vector<1x128xf32>
    %5 = vector.broadcast %4 : vector<1x128xf32> to vector<8x128xf32>
    %6 = arith.addf %3, %5 : vector<8x128xf32>
    %c0_6 = arith.constant 0 : index
    %c0_7 = arith.constant 0 : index
    %c0_8 = arith.constant 0 : index
    %7 = vector.load %arg9[%c0_6, %c0_7, %c0_8] : memref<1x8x128xf32, #tpu.memory_space<vmem>>, vector<1x8x128xf32>
    %8 = vector.shape_cast %7 : vector<1x8x128xf32> to vector<8x128xf32>
    %9 = vector.shape_cast %6 : vector<8x128xf32> to vector<1x8x128xf32>
    tpu.vector_store %arg9[%c0_6, %c0_7, %c0_8], %9 {strides = array<i32>} : memref<1x8x128xf32, #tpu.memory_space<vmem>>, vector<1x8x128xf32>,
    %c0_9 = arith.constant 0 : index
    %c0_10 = arith.constant 0 : index
    %10 = vector.load %arg4[%c0_9, %c0_10] : memref<128x128xf32, #tpu.memory_space<vmem>>, vector<128x128xf32>
    %cst_11 = arith.constant dense<0.000000e+00> : vector<8x128xf32>
    %11 = tpu.matmul %1, %10, %cst_11 {dimension_numbers = #tpu.dot_dimension_numbers<[1], [0], [0], [1], [0, 0, 1, 1], [], []>} : vector<8x128xf32>, vector<128x128xf32>, vector<8x128xf32> -> vector<8x128xf32>
    %c0_12 = arith.constant 0 : index
    %c0_13 = arith.constant 0 : index
    %12 = vector.load %arg7[%c0_12, %c0_13] : memref<1x128xf32, #tpu.memory_space<vmem>>, vector<1x128xf32>
    %13 = vector.broadcast %12 : vector<1x128xf32> to vector<8x128xf32>
    %14 = arith.addf %11, %13 : vector<8x128xf32>
    %c0_14 = arith.constant 0 : index
    %c0_15 = arith.constant 0 : index
    %c0_16 = arith.constant 0 : index
    %15 = vector.load %arg10[%c0_14, %c0_15, %c0_16] : memref<1x8x128xf32, #tpu.memory_space<vmem>>, vector<1x8x128xf32>
    %16 = vector.shape_cast %15 : vector<1x8x128xf32> to vector<8x128xf32>
    %17 = vector.shape_cast %14 : vector<8x128xf32> to vector<1x8x128xf32>
    tpu.vector_store %arg10[%c0_14, %c0_15, %c0_16], %17 {strides = array<i32>} : memref<1x8x128xf32, #tpu.memory_space<vmem>>, vector<1x8x128xf32>,
    %c0_17 = arith.constant 0 : index
    %c0_18 = arith.constant 0 : index
    %18 = vector.load %arg5[%c0_17, %c0_18] : memref<128x128xf32, #tpu.memory_space<vmem>>, vector<128x128xf32>
    %cst_19 = arith.constant dense<0.000000e+00> : vector<8x128xf32>
    %19 = tpu.matmul %1, %18, %cst_19 {dimension_numbers = #tpu.dot_dimension_numbers<[1], [0], [0], [1], [0, 0, 1, 1], [], []>} : vector<8x128xf32>, vector<128x128xf32>, vector<8x128xf32> -> vector<8x128xf32>
    %c0_20 = arith.constant 0 : index
    %c0_21 = arith.constant 0 : index
    %20 = vector.load %arg8[%c0_20, %c0_21] : memref<1x128xf32, #tpu.memory_space<vmem>>, vector<1x128xf32>
    %21 = vector.broadcast %20 : vector<1x128xf32> to vector<8x128xf32>
    %22 = arith.addf %19, %21 : vector<8x128xf32>
    %c0_22 = arith.constant 0 : index
    %c0_23 = arith.constant 0 : index
    %c0_24 = arith.constant 0 : index
    %23 = vector.load %arg11[%c0_22, %c0_23, %c0_24] : memref<1x8x128xf32, #tpu.memory_space<vmem>>, vector<1x8x128xf32>
    %24 = vector.shape_cast %23 : vector<1x8x128xf32> to vector<8x128xf32>
    %25 = vector.shape_cast %22 : vector<8x128xf32> to vector<1x8x128xf32>
    tpu.vector_store %arg11[%c0_22, %c0_23, %c0_24], %25 {strides = array<i32>} : memref<1x8x128xf32, #tpu.memory_space<vmem>>, vector<1x8x128xf32>,
    return
  }
  func.func @transform_0(%arg0: i32, %arg1: i32) -> (i32, i32, i32) {
    %c0_i32 = arith.constant 0 : i32
    %c0_i32_0 = arith.constant 0 : i32
    return %arg0, %arg1, %c0_i32 : i32, i32, i32
  }
  func.func @transform_1(%arg0: i32, %arg1: i32) -> (i32, i32) {
    %c0_i32 = arith.constant 0 : i32
    %c0_i32_0 = arith.constant 0 : i32
    %c0_i32_1 = arith.constant 0 : i32
    return %c0_i32, %c0_i32_0 : i32, i32
  }
  func.func @transform_2(%arg0: i32, %arg1: i32) -> (i32, i32) {
    %c0_i32 = arith.constant 0 : i32
    %c0_i32_0 = arith.constant 0 : i32
    %c0_i32_1 = arith.constant 0 : i32
    return %c0_i32, %c0_i32_0 : i32, i32
  }
  func.func @transform_3(%arg0: i32, %arg1: i32) -> (i32, i32) {
    %c0_i32 = arith.constant 0 : i32
    %c0_i32_0 = arith.constant 0 : i32
    %c0_i32_1 = arith.constant 0 : i32
    return %c0_i32, %c0_i32_0 : i32, i32
  }
  func.func @transform_4(%arg0: i32, %arg1: i32) -> (i32, i32) {
    %c0_i32 = arith.constant 0 : i32
    %c0_i32_0 = arith.constant 0 : i32
    %c0_i32_1 = arith.constant 0 : i32
    return %c0_i32, %c0_i32_0 : i32, i32
  }
  func.func @transform_5(%arg0: i32, %arg1: i32) -> (i32, i32) {
    %c0_i32 = arith.constant 0 : i32
    %c0_i32_0 = arith.constant 0 : i32
    %c0_i32_1 = arith.constant 0 : i32
    return %c0_i32, %c0_i32_0 : i32, i32
  }
  func.func @transform_6(%arg0: i32, %arg1: i32) -> (i32, i32) {
    %c0_i32 = arith.constant 0 : i32
    %c0_i32_0 = arith.constant 0 : i32
    %c0_i32_1 = arith.constant 0 : i32
    return %c0_i32, %c0_i32_0 : i32, i32
  }
  func.func @transform_7(%arg0: i32, %arg1: i32) -> (i32, i32, i32) {
    %c0_i32 = arith.constant 0 : i32
    %c0_i32_0 = arith.constant 0 : i32
    return %arg0, %arg1, %c0_i32 : i32, i32, i32
  }
  func.func @transform_8(%arg0: i32, %arg1: i32) -> (i32, i32, i32) {
    %c0_i32 = arith.constant 0 : i32
    %c0_i32_0 = arith.constant 0 : i32
    return %arg0, %arg1, %c0_i32 : i32, i32, i32
  }
  func.func @transform_9(%arg0: i32, %arg1: i32) -> (i32, i32, i32) {
    %c0_i32 = arith.constant 0 : i32
    %c0_i32_0 = arith.constant 0 : i32
    return %arg0, %arg1, %c0_i32 : i32, i32, i32
  }
}

</mosaic_0001>

<bundles_post_ra>
// kernel: tpu_custom_call.1
= control target key start
LH: loop header
LB: loop body
LE: loop exit
PB: predicated region body
PF: predicated region fallthrough
CT: control target
= control target key end

     0   :  { %s2274_s0 = inlined_call_operand.hbm [shape: f32[2,8,128], index: 0, kind: input, shape index: {}]   ;;  %s2275_s1 = inlined_call_operand.hbm [shape: f32[128,128], index: 1, kind: input, shape index: {}]   ;;  %s2276_s2 = inlined_call_operand.hbm [shape: f32[128,128], index: 2, kind: input, shape index: {}]   ;;  %s2277_s3 = inlined_call_operand.hbm [shape: f32[128,128], index: 3, kind: input, shape index: {}]   ;;  %s2278_s4 = inlined_call_operand.hbm [shape: f32[1,128], index: 4, kind: input, shape index: {}]   ;;  %s2279_s5 = inlined_call_operand.hbm [shape: f32[1,128], index: 5, kind: input, shape index: {}]   ;;  %s2280_s6 = inlined_call_operand.hbm [shape: f32[1,128], index: 6, kind: input, shape index: {}]   ;;  %s2281_s7 = inlined_call_operand.hbm [shape: f32[2,8,128], index: 7, kind: output, shape index: {0}]   ;;  %s2282_s8 = inlined_call_operand.hbm [shape: f32[2,8,128], index: 8, kind: output, shape index: {1}]   ;;  %s2283_s9 = inlined_call_operand.hbm [shape: f32[2,8,128], index: 9, kind: output, shape index: {2}]  }
   0x1   :  { %2293 = sst [smem:[#allocation24_spill]] %s2275_s1 }
   0x2   :  { %2294 = sst [smem:[#allocation25_spill]] %s2281_s7 }
   0x3   :  { %2295 = sst [smem:[#allocation26_spill]] %s2282_s8 }
   0x4   :  { %2296 = sst [smem:[#allocation27_spill]] %s2283_s9 }
   0x5   :  { %15 = vsyncpa [#allocation3], 0 }
   0x6   :  { %17 = vsyncpa [#allocation3 + $0x1], 0 }
   0x7   :  { %18 = vsyncpa [#allocation6], 0 }
   0x8   :  { %19 = vsyncpa [#allocation9], 0 }
   0x9   :  { %20 = vsyncpa [#allocation12], 0 }
   0xa   :  { %21 = vsyncpa [#allocation4], 0 }
   0xb   :  { %23 = vsyncpa [#allocation4 + $0x1], 0 }
   0xc   :  { %24 = vsyncpa [#allocation16], 0 }
   0xd   :  { %26 = vsyncpa [#allocation16 + $0x1], 0  ;;  %s1823_s30 = smov 0   ;;  %s1825_s10 = smov 0  }
   0xe   :  { %s1827_s11 = smov 0   ;;  %s1829_s12 = smov 0  }
   0xf   :  { %s1831_s13 = smov 0   ;;  %s1833_s14 = smov 0  }
  0x10 LB: > { %s1854_s15 = sadd.s32 4294967295, %s1756_s14   ;;  %p1006_p0 = scmp.ge.s32.totalorder %s1756_s14, 1  ;;  %s1756_s14 = sphi %s1833_s14, %s32_s14   ;;  %s1752_s13 = sphi %s1831_s13, %s2328_s13   ;;  %s1748_s12 = sphi %s1829_s12, %s2327_s12   ;;  %s1744_s11 = sphi %s1827_s11, %s2326_s11   ;;  %s1740_s10 = sphi %s1825_s10, %s2325_s10   ;;  %s1736_s30 = sphi %s1823_s30, %s2324_s30  }
  0x11   : > { %p2287_p1 = scmp.eq.s32.totalorder %s1854_s15, 0  ;;  %p287_p2 = scmp.lt.s32.totalorder %s1756_s14, 3 }
  0x12   : > { %s1758_s17 = smov [#allocation5]   ;;  %s1759_s20 = smov [#allocation8]  }
  0x13   : > { %p1859_p3 = pnand %p1006_p0, %p287_p2  ;;  %s299_s18 = sshll.u32 %s1758_s17, 4  ;;  %s1863_s18 = int_to_ptr.vmem [resolvable:$true] %s299_s18 }
  0x14   : > { %s325_s21 = sshll.u32 %s1759_s20, 4  ;;  %s1760_s22 = smov [#allocation11]   ;;  %s1874_s21 = int_to_ptr.vmem [resolvable:$true] %s325_s21 }
  0x15   : > { %s2297_s16 = scalar_select %p1859_p3, 1, 0 }
  0x16   : > { %p1298_p4 = pneg %p1859_p3  ;;  %s1876_s23 = sshll.u32 %s1760_s22, 4  ;;  %s351_s23 = int_to_ptr.vmem [resolvable:$true] %s1876_s23 }
  0x17   : > { %s2299_s1 = sld [smem:[#allocation24_spill]] }
  0x18   : > { %p1870_p6 = pnand %p1298_p4, %p2287_p1 }
  0x1a   : > { %p1886_p8 = pneg %p1870_p6 }
  0x1d   : > { %s1404_s26 = scalar_lea.hbm %s2299_s1, 2048 }
  0x1e   : > { %p1405_p7 = scmp.ne.s32.totalorder %s2299_s1, %s1404_s26  ;;  %p1411_p11 = scmp.lt.u32.totalorder %s1404_s26, %s2299_s1 }
  0x20   : > { %p1407_p9 = pnand %p1886_p8, %p1405_p7 }
  0x22   : > { %p1408_p10 = pneg %p1407_p9 }
  0x24   : > { %p1413_p12 = pnand %p1411_p11, %p1408_p10 }
  0x26   : > { %1416 = shalt.err (!%p1413_p12)
}
  0x27   : > { %s1417_s22 = scalar_lea.vmem %s1863_s18, 2048  ;;  %p1425_p4 = scmp.lt.s32.totalorder %s1863_s18, %s1863_s18 }
  0x28   : > { %p1418_p13 = scmp.ne.s32.totalorder %s1863_s18, %s1417_s22  ;;  %p1426_p5 = scmp.lt.s32.totalorder %s1417_s22, %s1417_s22 }
  0x2a   : > { %p1420_p0 = pnand %p1418_p13, %p1886_p8  ;;  %p1427_p7 = por %p1426_p5, %p1425_p4 }
  0x2c   : > { %p1421_p2 = pneg %p1420_p0 }
  0x2e   : > { %p1428_p9 = pnand %p1427_p7, %p1421_p2 }
  0x30   : > { %1431 = shalt.err (!%p1428_p9)
}
  0x31   : > { %s2289_s24 = smov 128   ;;  %s1762_s25 = smov 8  }
  0x32   : > { %1301 = dma.hbm_to_vmem [thread:$0]  (!%p1870_p6), %s2299_s1, 2048, %s1863_s18, [#allocation6], %s2289_s24, %s2289_s24, %s1762_s25  }
  0x33   : > { %s1432_s20 = scalar_lea.hbm %s2277_s3, 2048 }
  0x34   : > { %p1433_p5 = scmp.ne.s32.totalorder %s2277_s3, %s1432_s20  ;;  %p1439_p12 = scmp.lt.u32.totalorder %s1432_s20, %s2277_s3 }
  0x36   : > { %p1435_p10 = pnand %p1433_p5, %p1886_p8 }
  0x38   : > { %p1436_p11 = pneg %p1435_p10 }
  0x3a   : > { %p1441_p13 = pnand %p1439_p12, %p1436_p11 }
  0x3c   : > { %1444 = shalt.err (!%p1441_p13)
}
  0x3d   : > { %s1445_s18 = scalar_lea.vmem %s1874_s21, 2048  ;;  %p1453_p7 = scmp.lt.s32.totalorder %s1874_s21, %s1874_s21 }
  0x3e   : > { %p1446_p0 = scmp.ne.s32.totalorder %s1874_s21, %s1445_s18  ;;  %p1454_p9 = scmp.lt.s32.totalorder %s1445_s18, %s1445_s18 }
  0x40   : > { %p1448_p2 = pnand %p1446_p0, %p1886_p8  ;;  %p1455_p5 = por %p1454_p9, %p1453_p7 }
  0x42   : > { %p1449_p4 = pneg %p1448_p2 }
  0x44   : > { %p1456_p10 = pnand %p1455_p5, %p1449_p4 }
  0x46   : > { %1459 = shalt.err (!%p1456_p10)
}
  0x47   : > { %1307 = dma.hbm_to_vmem [thread:$0]  (!%p1870_p6), %s2277_s3, 2048, %s1874_s21, [#allocation9], %s2289_s24, %s2289_s24, %s1762_s25  }
  0x48   : > { %s1460_s27 = scalar_lea.hbm %s2279_s5, 16 }
  0x49   : > { %p1461_p11 = scmp.ne.s32.totalorder %s2279_s5, %s1460_s27  ;;  %p1467_p0 = scmp.lt.u32.totalorder %s1460_s27, %s2279_s5 }
  0x4b   : > { %p1463_p12 = pnand %p1461_p11, %p1886_p8 }
  0x4d   : > { %p1464_p13 = pneg %p1463_p12 }
  0x4f   : > { %p1469_p2 = pnand %p1467_p0, %p1464_p13 }
  0x51   : > { %1472 = shalt.err (!%p1469_p2)
}
  0x52   : > { %s1473_s18 = scalar_lea.vmem %s351_s23, 16  ;;  %s1480_s21 = scalar_lea.vmem %s351_s23, 32 }
  0x53   : > { %p1474_p4 = scmp.ne.s32.totalorder %s351_s23, %s1473_s18  ;;  %p1481_p5 = scmp.lt.s32.totalorder %s351_s23, %s351_s23 }
  0x54   : > { %p1482_p10 = scmp.lt.s32.totalorder %s1480_s21, %s1473_s18 }
  0x55   : > { %p1476_p7 = pnand %p1474_p4, %p1886_p8 }
  0x56   : > { %p1483_p1 = por %p1482_p10, %p1481_p5 }
  0x57   : > { %p1477_p9 = pneg %p1476_p7 }
  0x59   : > { %p1484_p3 = pnand %p1483_p1, %p1477_p9 }
  0x5b   : > { %1487 = shalt.err (!%p1484_p3)
}
  0x5c   : > { %1313 = dma.hbm_to_vmem [thread:$0]  (!%p1870_p6), %s2279_s5, 16, %s351_s23, [#allocation12]  }
  0x5d   : > { %s1763_s9 = smov [#allocation7]   ;;  %s1764_s27 = smov [#allocation10]  }
  0x5e   : > { %s312_s26 = sshll.u32 %s1763_s9, 4  ;;  %s339_s28 = sshll.u32 %s1764_s27, 4  ;;  %s313_s26 = int_to_ptr.vmem [resolvable:$true] %s312_s26  ;;  %s340_s28 = int_to_ptr.vmem [resolvable:$true] %s339_s28 }
  0x5f   : > { %s1488_s22 = scalar_lea.hbm %s2276_s2, 2048 }
  0x60   : > { %p1489_p1 = scmp.ne.s32.totalorder %s2276_s2, %s1488_s22  ;;  %p1495_p12 = scmp.lt.u32.totalorder %s1488_s22, %s2276_s2 }
  0x62   : > { %p1491_p3 = pnand %p1489_p1, %p1886_p8 }
  0x64   : > { %p1492_p11 = pneg %p1491_p3 }
  0x66   : > { %p1497_p13 = pnand %p1495_p12, %p1492_p11 }
  0x68   : > { %1500 = shalt.err (!%p1497_p13)
}
  0x69   : > { %s1501_s23 = scalar_lea.vmem %s313_s26, 2048  ;;  %p1509_p7 = scmp.lt.s32.totalorder %s313_s26, %s313_s26 }
  0x6a   : > { %p1502_p0 = scmp.ne.s32.totalorder %s313_s26, %s1501_s23  ;;  %p1510_p9 = scmp.lt.s32.totalorder %s1501_s23, %s1501_s23 }
  0x6c   : > { %p1504_p2 = pnand %p1502_p0, %p1886_p8  ;;  %p1511_p5 = por %p1510_p9, %p1509_p7 }
  0x6e   : > { %p1505_p4 = pneg %p1504_p2 }
  0x70   : > { %p1512_p10 = pnand %p1511_p5, %p1505_p4 }
  0x72   : > { %1515 = shalt.err (!%p1512_p10)
}
  0x73   : > { %s2301_s8 = smov 128   ;;  %s1516_s20 = scalar_lea.hbm %s2278_s4, 16 }
  0x74   : > { %1304 = dma.hbm_to_vmem [thread:$0]  (!%p1870_p6), %s2276_s2, 2048, %s313_s26, [#allocation6], %s2301_s8, %s2301_s8, %s1762_s25  }
  0x75   : > { %p1517_p1 = scmp.ne.s32.totalorder %s2278_s4, %s1516_s20  ;;  %p1523_p12 = scmp.lt.u32.totalorder %s1516_s20, %s2278_s4 }
  0x77   : > { %p1519_p3 = pnand %p1517_p1, %p1886_p8 }
  0x79   : > { %p1520_p11 = pneg %p1519_p3 }
  0x7b   : > { %p1525_p13 = pnand %p1523_p12, %p1520_p11 }
  0x7d   : > { %1528 = shalt.err (!%p1525_p13)
}
  0x7e   : > { %s1529_s23 = scalar_lea.vmem %s340_s28, 16  ;;  %s1536_s25 = scalar_lea.vmem %s340_s28, 32 }
  0x7f   : > { %p1530_p0 = scmp.ne.s32.totalorder %s340_s28, %s1529_s23  ;;  %p1537_p7 = scmp.lt.s32.totalorder %s340_s28, %s340_s28 }
  0x80   : > { %p1538_p9 = scmp.lt.s32.totalorder %s1536_s25, %s1529_s23 }
  0x81   : > { %p1532_p2 = pnand %p1530_p0, %p1886_p8 }
  0x82   : > { %p1539_p5 = por %p1538_p9, %p1537_p7 }
  0x83   : > { %p1533_p4 = pneg %p1532_p2 }
  0x85   : > { %p1540_p10 = pnand %p1539_p5, %p1533_p4 }
  0x87   : > { %1543 = shalt.err (!%p1540_p10)
}
  0x88   : > { %1310 = dma.hbm_to_vmem [thread:$0]  (!%p1870_p6), %s2278_s4, 16, %s340_s28, [#allocation9]  }
  0x89   : > { %s1765_s24 = smov [#allocation13]   ;;  %s1544_s20 = scalar_lea.hbm %s2280_s6, 16 }
  0x8a   : > { %s361_s9 = sshll.u32 %s1765_s24, 4  ;;  %p1545_p1 = scmp.ne.s32.totalorder %s2280_s6, %s1544_s20  ;;  %s362_s9 = int_to_ptr.vmem [resolvable:$true] %s361_s9 }
  0x8b   : > { %p1551_p12 = scmp.lt.u32.totalorder %s1544_s20, %s2280_s6 }
  0x8c   : > { %p1547_p3 = pnand %p1545_p1, %p1886_p8 }
  0x8e   : > { %p1548_p11 = pneg %p1547_p3 }
  0x90   : > { %p1553_p13 = pnand %p1551_p12, %p1548_p11 }
  0x92   : > { %1556 = shalt.err (!%p1553_p13)
}
  0x93   : > { %s1557_s28 = scalar_lea.vmem %s362_s9, 16  ;;  %s1564_s23 = scalar_lea.vmem %s362_s9, 32 }
  0x94   : > { %p1558_p0 = scmp.ne.s32.totalorder %s362_s9, %s1557_s28  ;;  %p1565_p7 = scmp.lt.s32.totalorder %s362_s9, %s362_s9 }
  0x95   : > { %p1566_p9 = scmp.lt.s32.totalorder %s1564_s23, %s1557_s28 }
  0x96   : > { %p1560_p2 = pnand %p1558_p0, %p1886_p8 }
  0x97   : > { %p1567_p5 = por %p1566_p9, %p1565_p7 }
  0x98   : > { %p1561_p4 = pneg %p1560_p2 }
  0x9a   : > { %p1568_p10 = pnand %p1567_p5, %p1561_p4 }
  0x9c   : > { %1571 = shalt.err (!%p1568_p10)
}
  0x9d   : > { %1316 = dma.hbm_to_vmem [thread:$0]  (!%p1870_p6), %s2280_s6, 16, %s362_s9, [#allocation12]  }
  0x9e   : > { %s2290_s29 = sadd.s32 4294967294, %s1756_s14   ;;  %s44_s8 = sadd.s32 1, %s1752_s13 }
  0x9f   : > { %p46_p8 = scmp.ge.s32.totalorder %s44_s8, 2  ;;  %s53_s19 = sadd.s32 1, %s1744_s11 }
  0xa0   : > { %p60_p1 = scmp.ne.s32.totalorder %s1744_s11, %s1740_s10  ;;  %p61_p3 = scmp.eq.s32.totalorder %s1756_s14, 0 }
  0xa1   : > { %s2330_s8 = smov (%p46_p8, %s44_s8), 0  ;;  %p66_p12 = scmp.ne.s32.totalorder %s1740_s10, %s1736_s30 }
  0xa2   : > { %p2020_p11 = por %p61_p3, %p60_p1  ;;  %s48_s9 = ssub.s32 %s1752_s13, %s2330_s8 }
  0xa3   : > { %p218_p6 = scmp.eq.s32.totalorder %s1854_s15, 1  ;;  %p51_p13 = scmp.eq.s32.totalorder %s48_s9, 0 }
  0xa4   : > { %p2303_p0 = scmp.eq.s32.totalorder %s1854_s15, 0  ;;  %p224_p7 = scmp.eq.s32.totalorder %s2290_s29, 1 }
  0xa5   : > { %p2035_p4 = por %p218_p6, %p60_p1  ;;  %p1337_p5 = scmp.lt.s32.totalorder %s1756_s14, 2 }
  0xa6   : > { %p2031_p2 = por %p2303_p0, %p66_p12  ;;  %p2044_p9 = por %p224_p7, %p66_p12 }
  0xa7   : > { %s2305_s17 = scalar_select %p2035_p4, 1, 0 }
  0xa8   : > { %s2042_s20 = scalar_select %p51_p13, %s1744_s11, %s53_s19  }
  0xa9   : > { %s2306_s22 = scalar_select %p2044_p9, 1, 0 }
  0xaa   : > { %s372_s18 = sand.u32 1, %s1744_s11   ;;  %s1015_s21 = sshll.u32 %s1752_s13, 7 }
  0xab   : > { %s1014_s7 = sshll.u32 %s372_s18, 3  ;;  %s2054_s25 = scalar_lea.hbm %s2274_s0, %s1015_s21 }
  0xac   : > { %s376_s26 = scalar_lea.vmem [#allocation2], %s1014_s7  ;;  %p2058_p10 = pnand %p1337_p5, %p2020_p11 }
  0xad   : > { %s384_s19 = sshll.u32 %s376_s26, 4  ;;  %s373_s29 = scalar_lea.sflag [#allocation3], %s372_s18  ;;  %s2062_s19 = int_to_ptr.vmem [resolvable:$true] %s384_s19 }
  0xae   : > { %s1572_s1 = scalar_lea.hbm %s2054_s25, 128  ;;  %p1574_p1 = pneg %p2058_p10 }
  0xaf   : > { %p1573_p8 = scmp.ne.s32.totalorder %s2054_s25, %s1572_s1  ;;  %s1577_s24 = scalar_lea.hbm %s2274_s0, 256 }
  0xb0   : > { %p1578_p11 = scmp.lt.u32.totalorder %s2054_s25, %s2274_s0  ;;  %p1579_p6 = scmp.lt.u32.totalorder %s1577_s24, %s1572_s1 }
  0xb1   : > { %p1575_p3 = pnand %p1574_p1, %p1573_p8  ;;  %p1581_p0 = scmp.lt.u32.totalorder %s1572_s1, %s2054_s25 }
  0xb2   : > { %p1580_p13 = por %p1579_p6, %p1578_p11 }
  0xb3   : > { %p1576_p12 = pneg %p1575_p3 }
  0xb4   : > { %p1582_p7 = por %p1581_p0, %p1580_p13 }
  0xb6   : > { %p1583_p5 = pnand %p1582_p7, %p1576_p12 }
  0xb8   : > { %1586 = shalt.err (!%p1583_p5)
}
  0xb9   : > { %s1587_s18 = scalar_lea.vmem %s2062_s19, 128  ;;  %s1766_s26 = smov [#allocation2]  }
  0xba   : > { %p1588_p8 = scmp.ne.s32.totalorder %s2062_s19, %s1587_s18  ;;  %s1592_s21 = sshll.u32 %s1766_s26, 4  ;;  %s1593_s21 = int_to_ptr.vmem [resolvable:$false] %s1592_s21 }
  0xbb   : > { %s1594_s7 = scalar_lea.vmem %s1593_s21, 256  ;;  %p1595_p4 = scmp.lt.s32.totalorder %s2062_s19, %s1593_s21 }
  0xbc   : > { %p1590_p3 = pnand %p1588_p8, %p1574_p1  ;;  %p1596_p11 = scmp.lt.s32.totalorder %s1594_s7, %s1587_s18 }
  0xbe   : > { %p1591_p9 = pneg %p1590_p3  ;;  %p1597_p6 = por %p1596_p11, %p1595_p4 }
  0xc0   : > { %p1598_p13 = pnand %p1597_p6, %p1591_p9 }
  0xc2   : > { %1601 = shalt.err (!%p1598_p13)
}
  0xc3   : > { %1320 = dma.hbm_to_vmem [thread:$0]  (!%p2058_p10), %s2054_s25, 128, %s2062_s19, %s373_s29  }
  0xc4   : > { %p2308_p12 = scmp.ne.s32.totalorder %s2297_s16, 0 }
  0xc5   : > { %s2092_s1 = sand.u32 (!%p2308_p12), 1, %s1740_s10  }
  0xc6   : > { %393 = sbr.rel (%p2308_p12) target bundleno = 528 (0x210), region = 48  ;;  %s2095_s24 = sshll.u32 (!%p2308_p12), %s2092_s1, 3 }
  0xc7   : > { %s396_s28 = scalar_lea.sflag (!%p2308_p12), [#allocation3], %s2092_s1  ;;  %s399_s23 = scalar_lea.vmem (!%p2308_p12), [#allocation2], %s2095_s24 }
  0xcd   : > { %1711 = dma.done.wait (%p2031_p2), %s396_s28, 128  }
  0xce   : > { %1713 = vsyncadd (%p2031_p2), %s396_s28, 4294967168  ;;  %p2309_p4 = scmp.eq.s32.totalorder %s1854_s15, 0 }
  0xd0   : > { %1715 = dma.done.wait (%p2309_p4), [#allocation6], 4096   ;;  %p2310_p9 = pmov %p2309_p4 }
  0xd1   : > { %p2311_p10 = pmov %p2309_p4 }
  0xd2   : > { %1717 = vsyncadd (%p2310_p9), [#allocation6], 4294963200 }
  0xd3   : > { %1719 = dma.done.wait (%p2311_p10), [#allocation9], 2064   ;;  %p2312_p1 = pmov %p2309_p4 }
  0xd5   : > { %1721 = vsyncadd (%p2312_p1), [#allocation9], 4294965232  ;;  %p2313_p0 = pmov %p2312_p1 }
  0xd7   : > { %1723 = dma.done.wait (%p2313_p0), [#allocation12], 32   ;;  %p2314_p7 = pmov %p2313_p0 }
  0xd8   : > { %v1767_v0 = vmov 0.0|0.0   ;;  %vm1768_vm0 = vmmov 0   ;;  %v1769_v1 = vmov 0.0   ;;  %v469_v2 = vld [vmem:[#allocation5] sm:$0xff]  ;;  %v470_v3 = vld [vmem:[#allocation5 + $0x8] sm:$0xff]  ;;  %v471_v4 = vld [vmem:[#allocation5 + $0x10] sm:$0xff] }
  0xd9   : > { %1725 = vsyncadd (%p2314_p7), [#allocation12], 4294967264  ;;  %1194 = vmatprep.subr.bf16.mxu0 %v1767_v0  ;;  %1218 = vmatprep.subr.bf16.mxu1 %v1767_v0  ;;  %v1195_v5 = vpack.c.bf16 %v470_v3, %v469_v2  ;;  %v472_v6 = vld [vmem:[#allocation5 + $0x18] sm:$0xff]  ;;  %v473_v8 = vld [vmem:[#allocation5 + $0x20] sm:$0xff]  ;;  %s2148_s16 = sshll.u32 %s1748_s12, 7  ;;  %s453_s29 = scalar_lea.vmem [#allocation14], %s2095_s24 }
  0xda   : > { %1121 = vmatprep.mubr.msk.f32.mxu0 %vm1768_vm0, %v1769_v1  ;;  %1156 = vmatprep.mubr.msk.f32.mxu1 %vm1768_vm0, %v1769_v1  ;;  %v1198_v7 = vpack.c.bf16 %v472_v6, %v471_v4  ;;  %v474_v9 = vld [vmem:[#allocation5 + $0x28] sm:$0xff]  ;;  %v563_v10 = vld [vmem:[#allocation7] sm:$0xff]  ;;  %v565_v14 = vld [vmem:[#allocation7 + $0x10] sm:$0xff]  ;;  %s776_s27 = sshll.u32 %s453_s29, 4  ;;  %s2315_s9 = sld [smem:[#allocation25_spill]]  ;;  %s2157_s27 = int_to_ptr.vmem [resolvable:$true] %s776_s27 }
  0xdb   : > { %1196 = vmatpush3.bf16.msra.mxu0 %v1195_v5  ;;  %v564_v11 = vld [vmem:[#allocation7 + $0x8] sm:$0xff]  ;;  %v1201_v13 = vpack.c.bf16 %v474_v9, %v473_v8  ;;  %v566_v15 = vld [vmem:[#allocation7 + $0x18] sm:$0xff]  ;;  %v475_v16 = vld [vmem:[#allocation5 + $0x30] sm:$0xff]  ;;  %s2292_s12 = scalar_lea.vmem [#allocation15], %s2095_s24  ;;  %s752_s7 = scalar_lea.sflag [#allocation4], %s2092_s1 }
  0xdc   : > { %1197 = vmatprep.subr.bf16.mxu0 %v1767_v0  ;;  %v1219_v12 = vpack.c.bf16 %v564_v11, %v563_v10  ;;  %v476_v17 = vld [vmem:[#allocation5 + $0x38] sm:$0xff]  ;;  %v1222_v18 = vpack.c.bf16 %v566_v15, %v565_v14  ;;  %v567_v19 = vld [vmem:[#allocation7 + $0x20] sm:$0xff]  ;;  %v568_v20 = vld [vmem:[#allocation7 + $0x28] sm:$0xff]  ;;  %s2163_s21 = sshll.u32 %s2292_s12, 4  ;;  %s1602_s28 = scalar_lea.vmem %s2157_s27, 128  ;;  %s2194_s21 = int_to_ptr.vmem [resolvable:$true] %s2163_s21 }
  0xdd   : > { %v1204_v21 = vpack.c.bf16 %v476_v17, %v475_v16  ;;  %v477_v22 = vld [vmem:[#allocation5 + $0x40] sm:$0xff]  ;;  %v478_v23 = vld [vmem:[#allocation5 + $0x48] sm:$0xff]  ;;  %v1225_v24 = vpack.c.bf16 %v568_v20, %v567_v19  ;;  %v569_v25 = vld [vmem:[#allocation7 + $0x30] sm:$0xff]  ;;  %p1603_p2 = scmp.ne.s32.totalorder %s2157_s27, %s1602_s28  ;;  %p2316_p5 = scmp.ne.s32.totalorder %s2305_s17, 0 }
  0xde   : > { %1220 = vmatpush3.bf16.msra.mxu1 %v1219_v12  ;;  %v570_v26 = vld [vmem:[#allocation7 + $0x38] sm:$0xff]  ;;  %v1207_v27 = vpack.c.bf16 %v478_v23, %v477_v22  ;;  %v479_v28 = vld [vmem:[#allocation5 + $0x50] sm:$0xff]  ;;  %v571_v31 = vld [vmem:[#allocation7 + $0x40] sm:$0xff] }
  0xdf   : > { %1199 = vmatpush3.bf16.msra.mxu0 %v1198_v7  ;;  %1221 = vmatprep.subr.bf16.mxu1 %v1767_v0  ;;  %v480_v29 = vld [vmem:[#allocation5 + $0x58] sm:$0xff]  ;;  %v1228_v30 = vpack.c.bf16 %v570_v26, %v569_v25  ;;  %v572_v32 = vld [vmem:[#allocation7 + $0x48] sm:$0xff]  ;;  %v481_v34 = vld [vmem:[#allocation5 + $0x60] sm:$0xff]  ;;  %p1604_p8 = pnand %p1603_p2, %p2316_p5 }
  0xe0   : > { %1200 = vmatprep.subr.bf16.mxu0 %v1767_v0  ;;  %v1210_v33 = vpack.c.bf16 %v480_v29, %v479_v28  ;;  %v482_v35 = vld [vmem:[#allocation5 + $0x68] sm:$0xff]  ;;  %v1231_v36 = vpack.c.bf16 %v572_v32, %v571_v31  ;;  %v573_v37 = vld [vmem:[#allocation7 + $0x50] sm:$0xff]  ;;  %v574_v38 = vld [vmem:[#allocation7 + $0x58] sm:$0xff]  ;;  %s2155_s18 = scalar_lea.hbm %s2315_s9, %s2148_s16 }
  0xe1   : > { %v1213_v39 = vpack.c.bf16 %v482_v35, %v481_v34  ;;  %v483_v40 = vld [vmem:[#allocation5 + $0x70] sm:$0xff]  ;;  %v484_v41 = vld [vmem:[#allocation5 + $0x78] sm:$0xff]  ;;  %v1234_v42 = vpack.c.bf16 %v574_v38, %v573_v37  ;;  %v575_v43 = vld [vmem:[#allocation7 + $0x60] sm:$0xff]  ;;  %p1605_p3 = pneg %p1604_p8 }
  0xe2   : > { %1223 = vmatpush3.bf16.msra.mxu1 %v1222_v18  ;;  %v576_v44 = vld [vmem:[#allocation7 + $0x68] sm:$0xff]  ;;  %v1216_v45 = vpack.c.bf16 %v484_v41, %v483_v40  ;;  %v657_v46 = vld [vmem:[#allocation8] sm:$0xff]  ;;  %v577_v49 = vld [vmem:[#allocation7 + $0x70] sm:$0xff] }
  0xe3   : > { %1202 = vmatpush3.bf16.msra.mxu0 %v1201_v13  ;;  %1224 = vmatprep.subr.bf16.mxu1 %v1767_v0  ;;  %v658_v47 = vld [vmem:[#allocation8 + $0x8] sm:$0xff]  ;;  %v1237_v48 = vpack.c.bf16 %v576_v44, %v575_v43  ;;  %v578_v50 = vld [vmem:[#allocation7 + $0x78] sm:$0xff]  ;;  %v659_v53 = vld [vmem:[#allocation8 + $0x10] sm:$0xff] }
  0xe4   : > { %1203 = vmatprep.subr.bf16.mxu0 %v1767_v0  ;;  %v468_v51 = vld [vmem:[%s399_s23] sm:$0xff]  ;;  %v1243_v52 = vpack.c.bf16 %v658_v47, %v657_v46  ;;  %v1240_v55 = vpack.c.bf16 %v578_v50, %v577_v49  ;;  %v661_v57 = vld [vmem:[#allocation8 + $0x20] sm:$0xff]  ;;  %v662_v58 = vld [vmem:[#allocation8 + $0x28] sm:$0xff]  ;;  %s1770_s23 = smov [#allocation14]  }
  0xe5   : > { %v660_v54 = vld [vmem:[#allocation8 + $0x18] sm:$0xff]  ;;  %v1249_v59 = vpack.c.bf16 %v662_v58, %v661_v57  ;;  %v663_v60 = vld [vmem:[#allocation8 + $0x30] sm:$0xff]  ;;  %v665_v63 = vld [vmem:[#allocation8 + $0x40] sm:$0xff]  ;;  %s1606_s25 = sshll.u32 %s1770_s23, 4  ;;  %s1607_s25 = int_to_ptr.vmem [resolvable:$false] %s1606_s25 }
  0xe6   : > { %1226 = vmatpush3.bf16.msra.mxu1 %v1225_v24  ;;  %v1246_v56 = vpack.c.bf16 %v660_v54, %v659_v53  ;;  %v664_v61 = vld [vmem:[#allocation8 + $0x38] sm:$0xff]  ;;  %v666_v2 = vld [vmem:[#allocation8 + $0x48] sm:$0xff]  ;;  %v667_v3 = vld [vmem:[#allocation8 + $0x50] sm:$0xff]  ;;  %s1608_s19 = scalar_lea.vmem %s1607_s25, 256  ;;  %p1609_p11 = scmp.lt.s32.totalorder %s2157_s27, %s1607_s25 }
  0xe7   : > { %1205 = vmatpush3.bf16.msra.mxu0 %v1204_v21  ;;  %1227 = vmatprep.subr.bf16.mxu1 %v1767_v0  ;;  %v1252_v62 = vpack.c.bf16 %v664_v61, %v663_v60  ;;  %v668_v4 = vld [vmem:[#allocation8 + $0x58] sm:$0xff]  ;;  %v669_v6 = vld [vmem:[#allocation8 + $0x60] sm:$0xff]  ;;  %v670_v7 = vld [vmem:[#allocation8 + $0x68] sm:$0xff]  ;;  %p1610_p6 = scmp.lt.s32.totalorder %s1608_s19, %s1602_s28 }
  0xe8   : > { %1206 = vmatprep.subr.bf16.mxu0 %v1767_v0  ;;  %v1258_v5 = vpack.c.bf16 %v668_v4, %v667_v3  ;;  %v1261_v8 = vpack.c.bf16 %v670_v7, %v669_v6  ;;  %v671_v9 = vld [vmem:[#allocation8 + $0x70] sm:$0xff]  ;;  %v672_v10 = vld [vmem:[#allocation8 + $0x78] sm:$0xff]  ;;  %v1027_v12 = vld [vmem:[#allocation10] ss:$0 sm:$0xff] }
  0xe9   : > { %v1264_v11 = vpack.c.bf16 %v672_v10, %v671_v9  ;;  %p1611_p13 = por %p1610_p6, %p1609_p11 }
  0xea   : > { %1229 = vmatpush3.bf16.msra.mxu1 %v1228_v30 }
  0xeb   : > { %1208 = vmatpush3.bf16.msra.mxu0 %v1207_v27  ;;  %1230 = vmatprep.subr.bf16.mxu1 %v1767_v0  ;;  %p1612_p12 = pnand %p1611_p13, %p1605_p3 }
  0xec   : > { %1209 = vmatprep.subr.bf16.mxu0 %v1767_v0 }
  0xee   : > { %1232 = vmatpush3.bf16.msra.mxu1 %v1231_v36 }
  0xef   : > { %1211 = vmatpush3.bf16.msra.mxu0 %v1210_v33  ;;  %1233 = vmatprep.subr.bf16.mxu1 %v1767_v0 }
  0xf0   : > { %1212 = vmatprep.subr.bf16.mxu0 %v1767_v0 }
  0xf2   : > { %1235 = vmatpush3.bf16.msra.mxu1 %v1234_v42 }
  0xf3   : > { %1214 = vmatpush3.bf16.msra.mxu0 %v1213_v39  ;;  %1236 = vmatprep.subr.bf16.mxu1 %v1767_v0 }
  0xf4   : > { %1215 = vmatprep.subr.bf16.mxu0 %v1767_v0 }
  0xf6   : > { %1238 = vmatpush3.bf16.msra.mxu1 %v1237_v48 }
  0xf7   : > { %1217 = vmatpush3.bf16.msra.mxu0 %v1216_v45  ;;  %1239 = vmatprep.subr.bf16.mxu1 %v1767_v0 }
  0xf8   : > { %1242 = vmatprep.subr.bf16.mxu0 %v1767_v0 }
  0xfa   : > { %1122 = vmatmul.mubr.f32.vlgmr.msra.gmra.mrb[0].mxu0 %v468_v51  ;;  %1241 = vmatpush3.bf16.msra.mxu1 %v1240_v55 }
  0xfb   : > { %1244 = vmatpush3.bf16.msra.mxu0 %v1243_v52  ;;  %1191 = vmatprep.mubr.msk.f32.mxu0 %vm1768_vm0, %v1769_v1  ;;  %v1255_v1 = vpack.c.bf16 %v666_v2, %v665_v63 }
  0xfc   : > { %1245 = vmatprep.subr.bf16.mxu0 %v1767_v0 }
  0xfd   : > { %1157 = vmatmul.mubr.f32.vlgmr.msra.gmra.mrb[0].mxu1 %v468_v51 }
  0xff   : > { %1247 = vmatpush3.bf16.msra.mxu0 %v1246_v56 }
 0x100   : > { %1248 = vmatprep.subr.bf16.mxu0 %v1767_v0 }
 0x103   : > { %1250 = vmatpush3.bf16.msra.mxu0 %v1249_v59 }
 0x104   : > { %1251 = vmatprep.subr.bf16.mxu0 %v1767_v0 }
 0x107   : > { %1253 = vmatpush3.bf16.msra.mxu0 %v1252_v62 }
 0x108   : > { %1254 = vmatprep.subr.bf16.mxu0 %v1767_v0 }
 0x10b   : > { %1256 = vmatpush3.bf16.msra.mxu0 %v1255_v1 }
 0x10c   : > { %1257 = vmatprep.subr.bf16.mxu0 %v1767_v0 }
 0x10f   : > { %1259 = vmatpush3.bf16.msra.mxu0 %v1258_v5 }
 0x110   : > { %1260 = vmatprep.subr.bf16.mxu0 %v1767_v0 }
 0x113   : > { %1262 = vmatpush3.bf16.msra.mxu0 %v1261_v8 }
 0x114   : > { %1263 = vmatprep.subr.bf16.mxu0 %v1767_v0  ;;  %v1028_v0 = vld [vmem:[#allocation11] ss:$0 sm:$0xff] }
 0x117   : > { %1265 = vmatpush3.bf16.msra.mxu0 %v1264_v11 }
 0x11a   : > { %1192 = vmatmul.mubr.f32.vlgmr.msra.gmra.mrb[2].mxu0 %v468_v51 }
 0x1cd   : > { %v558_v13 = vpop.f32.mrb[0].mxu0 }
 0x1ce   : > { %v559_v14 = vadd.f32 %v1027_v12, %v558_v13  ;;  %v1123_v15 = vpop.f32.mrb[1].mxu0 }
 0x1d0   : > { %562 = vst [vmem:[%s453_s29] sm:$0xff] %v559_v14 }
 0x1d1   : > { %1615 = shalt.err (!%p1612_p12)
}
 0x1d2   : > { %s1616_s1 = scalar_lea.hbm %s2155_s18, 128  ;;  %s1620_s23 = scalar_lea.hbm %s2315_s9, 256 }
 0x1d3   : > { %p1617_p4 = scmp.ne.s32.totalorder %s2155_s18, %s1616_s1  ;;  %p1621_p1 = scmp.lt.u32.totalorder %s2155_s18, %s2315_s9 }
 0x1d4   : > { %p1622_p0 = scmp.lt.u32.totalorder %s1620_s23, %s1616_s1  ;;  %p1624_p2 = scmp.lt.u32.totalorder %s1616_s1, %s2155_s18 }
 0x1d5   : > { %p1618_p9 = pnand %p1617_p4, %p2316_p5 }
 0x1d6   : > { %p1623_p7 = por %p1622_p0, %p1621_p1 }
 0x1d7   : > { %p1619_p10 = pneg %p1618_p9 }
 0x1d8   : > { %p1625_p8 = por %p1624_p2, %p1623_p7 }
 0x1da   : > { %p1626_p3 = pnand %p1625_p8, %p1619_p10 }
 0x1dc   : > { %1629 = shalt.err (!%p1626_p3)
}
 0x1dd   : > { %1292 = dma.vmem_to_hbm [thread:$0]  (%p2316_p5), %s2157_s27, 128, %s2155_s18, %s752_s7   ;;  %v652_v16 = vpop.f32.mrb[0].mxu1 }
 0x1de   : > { %v653_v17 = vadd.f32 %v1028_v0, %v652_v16  ;;  %v1158_v18 = vpop.f32.mrb[1].mxu1  ;;  %s2317_s28 = sld [smem:[#allocation26_spill]]  ;;  %s2318_s1 = scalar_lea.vmem [#allocation15], %s2095_s24 }
 0x1df   : > { %s2319_s29 = sand.u32 1, %s1854_s15   ;;  %s1630_s25 = scalar_lea.vmem %s2194_s21, 128 }
 0x1e0   : > { %656 = vst [vmem:[%s2318_s1] sm:$0xff] %v653_v17  ;;  %s2200_s23 = scalar_lea.sflag [#allocation16], %s2319_s29  ;;  %p1631_p11 = scmp.ne.s32.totalorder %s2194_s21, %s1630_s25 }
 0x1e1   : > { %s1771_s27 = smov [#allocation15]  }
 0x1e2   : > { %p1632_p6 = pnand %p1631_p11, %p2316_p5  ;;  %s1634_s18 = sshll.u32 %s1771_s27, 4  ;;  %s1635_s18 = int_to_ptr.vmem [resolvable:$false] %s1634_s18 }
 0x1e3   : > { %s1636_s7 = scalar_lea.vmem %s1635_s18, 256  ;;  %p1637_p12 = scmp.lt.s32.totalorder %s2194_s21, %s1635_s18 }
 0x1e4   : > { %s2191_s19 = scalar_lea.hbm %s2317_s28, %s2148_s16  ;;  %p1633_p13 = pneg %p1632_p6 }
 0x1e5   : > { %p1638_p4 = scmp.lt.s32.totalorder %s1636_s7, %s1630_s25 }
 0x1e7   : > { %p1639_p9 = por %p1638_p4, %p1637_p12 }
 0x1e9   : > { %p1640_p10 = pnand %p1639_p9, %p1633_p13 }
 0x1eb   : > { %1643 = shalt.err (!%p1640_p10)
}
 0x1ec   : > { %s1644_s15 = scalar_lea.hbm %s2191_s19, 128  ;;  %s1648_s1 = scalar_lea.hbm %s2317_s28, 256 }
 0x1ed   : > { %p1645_p1 = scmp.ne.s32.totalorder %s2191_s19, %s1644_s15  ;;  %p1649_p2 = scmp.lt.u32.totalorder %s2191_s19, %s2317_s28 }
 0x1ee   : > { %p1650_p8 = scmp.lt.u32.totalorder %s1648_s1, %s1644_s15  ;;  %p1652_p11 = scmp.lt.u32.totalorder %s1644_s15, %s2191_s19 }
 0x1ef   : > { %p1646_p0 = pnand %p1645_p1, %p2316_p5 }
 0x1f0   : > { %p1651_p3 = por %p1650_p8, %p1649_p2 }
 0x1f1   : > { %p1647_p7 = pneg %p1646_p0 }
 0x1f2   : > { %p1653_p6 = por %p1652_p11, %p1651_p3 }
 0x1f4   : > { %p1654_p13 = pnand %p1653_p6, %p1647_p7 }
 0x1f6   : > { %1657 = shalt.err (!%p1654_p13)
}
 0x1f7   : > { %1293 = dma.vmem_to_hbm [thread:$0]  (%p2316_p5), %s2194_s21, 128, %s2191_s19, %s2200_s23   ;;  %v1029_v19 = vld [vmem:[#allocation13] ss:$0 sm:$0xff]  ;;  %v746_v20 = vpop.f32.mrb[2].mxu0 }
 0x1f8   : > { %s467_s25 = scalar_lea.vmem [#allocation17], %s2095_s24  ;;  %v747_v21 = vadd.f32 %v1029_v19, %v746_v20  ;;  %v1193_v22 = vpop.f32.mrb[3].mxu0  ;;  %s2320_s26 = sld [smem:[#allocation27_spill]] }
 0x1f9   : > { %s804_s18 = sshll.u32 %s467_s25, 4  ;;  %s1772_s29 = smov [#allocation17]   ;;  %s805_s18 = int_to_ptr.vmem [resolvable:$true] %s804_s18 }
 0x1fa   : > { %750 = vst [vmem:[%s467_s25] sm:$0xff] %v747_v21  ;;  %s1658_s1 = scalar_lea.vmem %s805_s18, 128  ;;  %s1662_s21 = sshll.u32 %s1772_s29, 4  ;;  %s1663_s21 = int_to_ptr.vmem [resolvable:$false] %s1662_s21 }
 0x1fb   : > { %p1659_p12 = scmp.ne.s32.totalorder %s805_s18, %s1658_s1  ;;  %s1664_s24 = scalar_lea.vmem %s1663_s21, 256 }
 0x1fc   : > { %p1665_p10 = scmp.lt.s32.totalorder %s805_s18, %s1663_s21  ;;  %p1666_p1 = scmp.lt.s32.totalorder %s1664_s24, %s1658_s1 }
 0x1fd   : > { %p1660_p4 = pnand %p1659_p12, %p2316_p5 }
 0x1fe   : > { %s2229_s12 = scalar_lea.hbm %s2320_s26, %s2148_s16  ;;  %p1667_p0 = por %p1666_p1, %p1665_p10 }
 0x1ff   : > { %p1661_p9 = pneg %p1660_p4 }
 0x201   : > { %p1668_p7 = pnand %p1667_p0, %p1661_p9 }
 0x203   : > { %1671 = shalt.err (!%p1668_p7)
}
 0x204   : > { %s1672_s16 = scalar_lea.hbm %s2229_s12, 128  ;;  %s1676_s25 = scalar_lea.hbm %s2320_s26, 256 }
 0x205   : > { %p1673_p2 = scmp.ne.s32.totalorder %s2229_s12, %s1672_s16  ;;  %p1677_p11 = scmp.lt.u32.totalorder %s2229_s12, %s2320_s26 }
 0x206   : > { %p1678_p6 = scmp.lt.u32.totalorder %s1676_s25, %s1672_s16  ;;  %p1680_p12 = scmp.lt.u32.totalorder %s1672_s16, %s2229_s12 }
 0x207   : > { %p1674_p8 = pnand %p1673_p2, %p2316_p5 }
 0x208   : > { %p1679_p13 = por %p1678_p6, %p1677_p11 }
 0x209   : > { %p1675_p3 = pneg %p1674_p8 }
 0x20a   : > { %p1681_p4 = por %p1680_p12, %p1679_p13 }
 0x20c   : > { %p1682_p9 = pnand %p1681_p4, %p1675_p3 }
 0x20e   : > { %1685 = shalt.err (!%p1682_p9)
}
 0x20f   : > { %1294 = dma.vmem_to_hbm [thread:$0]  (%p2316_p5), %s805_s18, 128, %s2229_s12, %s2200_s23  }
 0x210 PF: > { %s816_s1 = sand.u32 1, %s1736_s30   ;;  %p2321_p10 = scmp.ne.s32.totalorder %s2306_s22, 0 }
 0x211   : > { %p2322_p1 = scmp.ge.s32.totalorder %s1756_s14, 2  ;;  %s817_s29 = scalar_lea.sflag [#allocation4], %s816_s1 }
 0x213   : > { %p1322_p0 = pnand %p2322_p1, %p2321_p10 }
 0x215   : > { %1727 = dma.done.wait (!%p1322_p0), %s817_s29, 128  }
 0x216   : > { %1729 = vsyncadd (!%p1322_p0), %s817_s29, 4294967168  ;;  %s2323_s21 = sadd.s32 4294967294, %s1756_s14  }
 0x217   : > { %s825_s24 = sand.u32 1, %s2323_s21  }
 0x218   : > { %s826_s16 = scalar_lea.sflag [#allocation16], %s825_s24 }
 0x219   : > { %1731 = dma.done.wait (!%p1322_p0), %s826_s16, 256  }
 0x21a   : > { %1733 = vsyncadd (!%p1322_p0), %s826_s16, 4294967040  ;;  %s32_s14 = sadd.s32 1, %s1756_s14   ;;  %s2324_s30 = smov %s1740_s10 }
 0x21b   : > { %p29_p5 = scmp.ge.s32.totalorder %s32_s14, 4   ;;  %s2325_s10 = smov %s1744_s11 }
 0x21c   : > { %s2326_s11 = smov %s2042_s20  ;;  %s2327_s12 = smov %s1752_s13 }
 0x21d   : > { %s2328_s13 = smov %s2330_s8  ;;  %31 = sbr.rel (!%p29_p5) target bundleno = 16 (0x10), region = 149 }
 0x224   :  { %840 = vsyncpa [#allocation3], 1 }
 0x225   :  { %842 = vsyncpa [#allocation3 + $0x1], 1 }
 0x226   :  { %843 = vsyncpa [#allocation6], 1 }
 0x227   :  { %844 = vsyncpa [#allocation9], 1 }
 0x228   :  { %845 = vsyncpa [#allocation12], 1 }
 0x229   :  { %846 = vsyncpa [#allocation4], 1 }
 0x22a   :  { %848 = vsyncpa [#allocation4 + $0x1], 1 }
 0x22b   :  { %849 = vsyncpa [#allocation16], 1 }
 0x22c   :  { %851 = vsyncpa [#allocation16 + $0x1], 1 }

</bundles_post_ra>
